<compile_context>
chip_gen: v7x
topology: tpu7x:2x2x1
jax: 0.10.0
libtpu: 0.0.40
codegen_flags: <defaults>
</compile_context>

<pallas_src>
import functools

import jax
import jax.numpy as jnp
from jax.experimental import pallas as pl
from jax.experimental.pallas import tpu as pltpu


# ---------------------------------------------------------------------------
# Kernels
# ---------------------------------------------------------------------------
def _avg_pool_kernel(x_ref, p_ref, o_ref, *, post_scale):
    # x_ref: (TN, g*HW)   p_ref: (g*HW, g*HoWo)   o_ref: (TN, g*HoWo)
    # Average pooling == one lane-dense MXU matmul with a block-diagonal averaging
    # matrix. Inputs feed the MXU in their native dtype (bf16 stays bf16); the
    # accumulation is always f32.
    acc = jnp.dot(x_ref[...], p_ref[...], preferred_element_type=jnp.float32)
    if post_scale != 1.0:
        acc = acc * post_scale            # only used for non-power-of-two windows
    o_ref[...] = acc.astype(o_ref.dtype)


def _max_pool_kernel(x_ref, s_ref, o_ref, *, W, kh, kw):
    # x_ref: (TN, g*HW)   s_ref: (g*HW, g*HoWo)   o_ref: (TN, g*HoWo)
    # Per-lane window max via kh*kw-1 lane rolls + running maximum (XLU/VPU, MXU-free),
    # then a single exact one-hot selection matmul gathering each window's bottom-right
    # anchor. rolled[j] = x[j - shift], so acc[anchor] = max over the whole window.
    # Anchors sit >= max-shift lanes into each folded image block, so roll wrap-around
    # never contributes to a selected lane.
    x = x_ref[...]
    acc = x
    for di in range(kh):
        for dj in range(kw):
            if di == 0 and dj == 0:
                continue
            acc = jnp.maximum(acc, pltpu.roll(x, shift=di * W + dj, axis=1))
    o_ref[...] = jnp.dot(
        acc, s_ref[...], preferred_element_type=jnp.float32
    ).astype(o_ref.dtype)


# ---------------------------------------------------------------------------
# Pooling-matrix construction (host/XLA side, tiny constants)
# ---------------------------------------------------------------------------
def _pool_coords(H, W, kh, kw, g):
    Ho, Wo = H // kh, W // kw
    HW, HoWo = H * W, Ho * Wo
    r = jnp.arange(g * HW)
    rb, rl = r // HW, r % HW
    rh, rw = rl // W, rl % W
    c = jnp.arange(g * HoWo)
    cb, cl = c // HoWo, c % HoWo
    ch, cw = cl // Wo, cl % Wo
    return (rb, rh, rw), (cb, ch, cw)


def _avg_matrix(H, W, kh, kw, g, dtype, weight):
    # Block-diagonal (g*HW, g*HoWo) averaging matrix. `weight` is 1/(kh*kw) when that
    # is exactly representable (power-of-two window), otherwise 1.0 (0/1 sum matrix,
    # scaled in-kernel in f32).
    (rb, rh, rw), (cb, ch, cw) = _pool_coords(H, W, kh, kw, g)
    in_win = (
        (rb[:, None] == cb[None, :])
        & ((rh[:, None] // kh) == ch[None, :])
        & ((rw[:, None] // kw) == cw[None, :])
    )
    return (in_win.astype(jnp.float32) * weight).astype(dtype)


def _max_select_matrix(H, W, kh, kw, g, dtype):
    # Block-diagonal one-hot matrix picking each window's bottom-right anchor lane.
    (rb, rh, rw), (cb, ch, cw) = _pool_coords(H, W, kh, kw, g)
    sel = (
        (rb[:, None] == cb[None, :])
        & (rh[:, None] == ch[None, :] * kh + (kh - 1))
        & (rw[:, None] == cw[None, :] * kw + (kw - 1))
    )
    return sel.astype(dtype)


# ---------------------------------------------------------------------------
# Tiling helpers
# ---------------------------------------------------------------------------
def _fold_factor(NC, HoWo):
    """Smallest g dividing NC with g*HoWo >= 128 lanes (dense output stores)."""
    if HoWo >= 128 or NC <= 1:
        return 1
    g_target = -(-128 // HoWo)
    for cand in range(g_target, min(NC, 8 * g_target) + 1):
        if NC % cand == 0:
            return cand
    return 1


def _rows_per_block(n_rows, row_bytes, sublane, target_bytes=8 << 20, min_blocks=4):
    """~8 MiB input tiles (amortize per-step pipeline overhead), but keep >= min_blocks
    grid steps when possible so both v7x TensorCores get work; round to the dtype's
    native sublane packing."""
    tn = max(1, target_bytes // max(1, row_bytes))
    tn = min(tn, max(1, -(-n_rows // min_blocks)))
    if tn >= n_rows:
        return n_rows                       # single full-extent block
    tn = max(sublane, (tn // sublane) * sublane)
    return min(tn, n_rows)


# ---------------------------------------------------------------------------
# Wrapper (PoolLayer.forward)
# ---------------------------------------------------------------------------
def pool_layer_forward(x, kernel=(2, 2), pool_type="avg"):
    """PoolLayer.forward. x: (T, n_batch, C, H, W) in the PyTorch NCHW convention."""
    assert pool_type in ("avg", "max", "adjusted_avg")
    kh, kw = kernel
    T, B, C, H, W = x.shape
    assert H % kh == 0 and W % kw == 0, "kernel must evenly divide spatial dims"
    Ho, Wo = H // kh, W // kw
    NC = T * B * C
    HW, HoWo = H * W, Ho * Wo

    # MXU-native compute dtype: bf16 / f32 pass straight through, everything else f32.
    compute_dtype = x.dtype if x.dtype in (jnp.bfloat16, jnp.float32) else jnp.float32

    # Fold g images per matmul row -> output minor dim g*HoWo >= 128.
    g = _fold_factor(NC, HoWo)
    n_rows = NC // g
    lane_in, lane_out = g * HW, g * HoWo

    # Free (contiguous) reshape only -- no transpose, no extra HBM pass.
    x2 = x.reshape(n_rows, lane_in)
    if x2.dtype != compute_dtype:
        x2 = x2.astype(compute_dtype)

    itemsize = jnp.dtype(compute_dtype).itemsize
    sublane = max(8, 32 // itemsize)            # 8 f32 / 16 bf16 / 32 int8
    tn = _rows_per_block(n_rows, lane_in * itemsize, sublane)
    grid = (pl.cdiv(n_rows, tn),)

    win = kh * kw
    pow2_win = (win & (win - 1)) == 0

    if pool_type == "max":
        mats = _max_select_matrix(H, W, kh, kw, g, compute_dtype)
        kernel_fn = functools.partial(_max_pool_kernel, W=W, kh=kh, kw=kw)
    else:
        # 'avg' and 'adjusted_avg' have identical forward semantics (avg_pool2d).
        weight = (1.0 / win) if pow2_win else 1.0
        post_scale = 1.0 if pow2_win else (1.0 / win)
        mats = _avg_matrix(H, W, kh, kw, g, compute_dtype, weight)
        kernel_fn = functools.partial(_avg_pool_kernel, post_scale=post_scale)

    flops = 2 * n_rows * lane_in * lane_out
    bytes_accessed = (
        n_rows * lane_in * itemsize
        + n_rows * lane_out * jnp.dtype(x.dtype).itemsize
        + int(mats.size) * itemsize
    )

    out2 = pl.pallas_call(
        kernel_fn,
        out_shape=jax.ShapeDtypeStruct((n_rows, lane_out), x.dtype),
        grid_spec=pltpu.PrefetchScalarGridSpec(
            num_scalar_prefetch=0,
            grid=grid,
            in_specs=[
                pl.BlockSpec((tn, lane_in), lambda n: (n, 0)),        # streamed rows
                pl.BlockSpec((lane_in, lane_out), lambda n: (0, 0)),  # constant matrix
            ],
            out_specs=pl.BlockSpec((tn, lane_out), lambda n: (n, 0)),
        ),
        compiler_params=pltpu.CompilerParams(
            dimension_semantics=("parallel",),
            vmem_limit_bytes=48 * 1024 * 1024,   # safe on v5e/v6e (128 MiB) & v7x (64 MiB)
        ),
        cost_estimate=pl.CostEstimate(
            flops=flops, transcendentals=0, bytes_accessed=bytes_accessed
        ),
    )(x2, mats)

    # Free reshape back to (T, B, C, Ho, Wo) -- folded images come out in order.
    return out2.reshape(T, B, C, Ho, Wo)


# ---------------------------------------------------------------------------
# Pure-JAX reference
# ---------------------------------------------------------------------------
def _reference_pool(x, kernel, pool_type):
    kh, kw = kernel
    T, B, C, H, W = x.shape
    xr = x.reshape(T, B, C, H // kh, kh, W // kw, kw)
    if pool_type == "max":
        return jnp.max(jnp.max(xr, axis=6), axis=4)
    return jnp.mean(jnp.mean(xr.astype(jnp.float32), axis=6), axis=4).astype(x.dtype)


if __name__ == "__main__":
    # Shapes implied by the module's forward: (T, n_batch, C, H, W); kernel_size=(2,2).
    T, B, C, H, W = 2, 2, 4, 16, 16
    kernel = (2, 2)

    key = jax.random.PRNGKey(0)
    x = jax.random.normal(key, (T, B, C, H, W), dtype=jnp.float32)

    ok = True
    for pool_type in ("avg", "max", "adjusted_avg"):
        out = pool_layer_forward(x, kernel=kernel, pool_type=pool_type)
        out = jax.block_until_ready(out)
        ref = _reference_pool(x, kernel, pool_type)
        if out.shape != (T, B, C, H // kernel[0], W // kernel[1]):
            ok = False
        if not jnp.allclose(out, ref, atol=1e-5, rtol=1e-5):
            ok = False

    # TODO(synk): PoolFunc.backward (adjusted_avg custom gradient) is backward-only and
    # is not part of this forward-pass kernel.

    if ok:
        print("KERNEL_OK")
</pallas_src>

<mosaic_0001>
module attributes {stable_mosaic.version = 11 : i64} {
  func.func @_avg_pool_kernel(%arg0: i32, %arg1: memref<8x512xf32, #tpu.memory_space<vmem>>, %arg2: memref<512x128xf32, #tpu.memory_space<vmem>>, %arg3: memref<8x128xf32, #tpu.memory_space<vmem>>) attributes {dimension_semantics = [#tpu.dimension_semantics<parallel>], iteration_bounds = array<i64: 1>, scalar_prefetch = 0 : i64, scratch_operands = 0 : i64, tpu.core_type = #tpu.core_type<tc>, window_params = [{transform_indices = @transform_0, window_bounds = array<i64: 8, 512>}, {pipeline_mode = #tpu.pipeline_mode<synchronous>, transform_indices = @transform_1, window_bounds = array<i64: 512, 128>}, {transform_indices = @transform_2, window_bounds = array<i64: 8, 128>}]} {
    %c0 = arith.constant 0 : index
    %c0_0 = arith.constant 0 : index
    %0 = vector.load %arg1[%c0, %c0_0] : memref<8x512xf32, #tpu.memory_space<vmem>>, vector<8x512xf32>
    %c0_1 = arith.constant 0 : index
    %c0_2 = arith.constant 0 : index
    %1 = vector.load %arg2[%c0_1, %c0_2] : memref<512x128xf32, #tpu.memory_space<vmem>>, vector<512x128xf32>
    %cst = arith.constant dense<0.000000e+00> : vector<8x128xf32>
    %2 = tpu.matmul %0, %1, %cst {dimension_numbers = #tpu.dot_dimension_numbers<[1], [0], [0], [1], [0, 0, 1, 1], [], []>} : vector<8x512xf32>, vector<512x128xf32>, vector<8x128xf32> -> vector<8x128xf32>
    %c0_3 = arith.constant 0 : index
    %c0_4 = arith.constant 0 : index
    %3 = vector.load %arg3[%c0_3, %c0_4] : memref<8x128xf32, #tpu.memory_space<vmem>>, vector<8x128xf32>
    tpu.vector_store %arg3[%c0_3, %c0_4], %2 {strides = array<i32>} : memref<8x128xf32, #tpu.memory_space<vmem>>, vector<8x128xf32>,
    return
  }
  func.func @transform_0(%arg0: i32) -> (i32, i32) {
    %c0_i32 = arith.constant 0 : i32
    %c0_i32_0 = arith.constant 0 : i32
    return %arg0, %c0_i32 : i32, i32
  }
  func.func @transform_1(%arg0: i32) -> (i32, i32) {
    %c0_i32 = arith.constant 0 : i32
    %c0_i32_0 = arith.constant 0 : i32
    %c0_i32_1 = arith.constant 0 : i32
    return %c0_i32, %c0_i32_0 : i32, i32
  }
  func.func @transform_2(%arg0: i32) -> (i32, i32) {
    %c0_i32 = arith.constant 0 : i32
    %c0_i32_0 = arith.constant 0 : i32
    return %arg0, %c0_i32 : i32, i32
  }
}

</mosaic_0001>

<bundles_post_ra>
// kernel: tpu_custom_call.1
= control target key start
LH: loop header
LB: loop body
LE: loop exit
PB: predicated region body
PF: predicated region fallthrough
CT: control target
= control target key end

     0   :  { %7 = vsyncpa [#allocation3], 0  ;;  %s537_s0 = inlined_call_operand.hbm [shape: f32[8,512], index: 0, kind: input, shape index: {}]   ;;  %s538_s1 = inlined_call_operand.hbm [shape: f32[512,128], index: 1, kind: input, shape index: {}]   ;;  %s539_s2 = inlined_call_operand.hbm [shape: f32[8,128], index: 2, kind: output, shape index: {}]  }
   0x1   :  { %8 = vsyncpa [#allocation6], 0 }
   0x2   :  { %9 = vsyncpa [#allocation4], 0  ;;  %s474_s9 = smov [#allocation2]   ;;  %s475_s11 = smov [#allocation5]  }
   0x3   :  { %s16_s10 = sshll.u32 %s474_s9, 4  ;;  %s25_s12 = sshll.u32 %s475_s11, 4  ;;  %s17_s10 = int_to_ptr.vmem [resolvable:$true] %s16_s10  ;;  %s494_s12 = int_to_ptr.vmem [resolvable:$true] %s25_s12 }
   0x4   :  { %s402_s15 = scalar_lea.hbm %s537_s0, 512 }
   0x5   :  { %p403_p0 = scmp.ne.s32.totalorder %s537_s0, %s402_s15  ;;  %p406_p1 = scmp.lt.u32.totalorder %s402_s15, %s537_s0 }
   0x7   :  { %p408_p2 = pnand %p406_p1, %p403_p0 }
   0x9   :  { %411 = shalt.err (!%p408_p2)
}
   0xa   :  { %s412_s20 = scalar_lea.vmem %s17_s10, 512  ;;  %p417_p4 = scmp.lt.s32.totalorder %s17_s10, %s17_s10 }
   0xb   :  { %p413_p3 = scmp.ne.s32.totalorder %s17_s10, %s412_s20  ;;  %p418_p5 = scmp.lt.s32.totalorder %s412_s20, %s412_s20 }
   0xd   :  { %p419_p6 = por %p418_p5, %p417_p4 }
   0xf   :  { %p420_p7 = pnand %p419_p6, %p413_p3 }
  0x11   :  { %423 = shalt.err (!%p420_p7)
}
  0x12   :  { %19 = dma.hbm_to_vmem [thread:$0]  %s537_s0, 512, %s17_s10, [#allocation3]  }
  0x13   :  { %s424_s25 = scalar_lea.hbm %s538_s1, 8192 }
  0x14   :  { %p425_p8 = scmp.ne.s32.totalorder %s538_s1, %s424_s25  ;;  %p428_p9 = scmp.lt.u32.totalorder %s424_s25, %s538_s1 }
  0x16   :  { %p430_p10 = pnand %p428_p9, %p425_p8 }
  0x18   :  { %433 = shalt.err (!%p430_p10)
}
  0x19   :  { %s434_s30 = scalar_lea.vmem %s494_s12, 8192  ;;  %p439_p12 = scmp.lt.s32.totalorder %s494_s12, %s494_s12 }
  0x1a   :  { %p435_p11 = scmp.ne.s32.totalorder %s494_s12, %s434_s30  ;;  %p440_p13 = scmp.lt.s32.totalorder %s434_s30, %s434_s30 }
  0x1c   :  { %p441_p0 = por %p440_p13, %p439_p12 }
  0x1e   :  { %p442_p1 = pnand %p441_p0, %p435_p11 }
  0x20   :  { %445 = shalt.err (!%p442_p1)
}
  0x21   :  { %s476_s0 = smov 128   ;;  %s477_s3 = smov 8  }
  0x22   :  { %31 = dma.hbm_to_vmem [thread:$0]  %s538_s1, 8192, %s494_s12, [#allocation6], %s476_s0, %s476_s0, %s477_s3  }
  0x23   :  { %468 = dma.done.wait [#allocation3], 512  }
  0x24   :  { %469 = vsyncadd [#allocation3], 4294966784 }
  0x25   :  { %470 = dma.done.wait [#allocation6], 8192  }
  0x26   :  { %471 = vsyncadd [#allocation6], 4294959104  ;;  %v58_v0 = vld [vmem:[#allocation5 + $0x80] sm:$0xff]  ;;  %v59_v1 = vld [vmem:[#allocation5 + $0x88] sm:$0xff]  ;;  %s478_s1 = smov [#allocation7]  }
  0x27   :  { %v90_v2 = vld [vmem:[#allocation5 + $0x180] sm:$0xff]  ;;  %v333_v3 = vpack.c.bf16 %v59_v1, %v58_v0  ;;  %v91_v4 = vld [vmem:[#allocation5 + $0x188] sm:$0xff]  ;;  %v60_v11 = vld [vmem:[#allocation5 + $0x90] sm:$0xff]  ;;  %s253_s6 = sshll.u32 %s478_s1, 4  ;;  %s254_s6 = int_to_ptr.vmem [resolvable:$true] %s253_s6 }
  0x28   :  { %v42_v5 = vld [vmem:[#allocation5] sm:$0xff]  ;;  %v43_v6 = vld [vmem:[#allocation5 + $0x8] sm:$0xff]  ;;  %v365_v7 = vpack.c.bf16 %v91_v4, %v90_v2  ;;  %v61_v13 = vld [vmem:[#allocation5 + $0x98] sm:$0xff]  ;;  %s446_s7 = scalar_lea.vmem %s254_s6, 128  ;;  %p451_p3 = scmp.lt.s32.totalorder %s254_s6, %s254_s6 }
  0x29   :  { %v335_v8 = vpack.c.bf16 %v43_v6, %v42_v5  ;;  %v74_v9 = vld [vmem:[#allocation5 + $0x100] sm:$0xff]  ;;  %v75_v10 = vld [vmem:[#allocation5 + $0x108] sm:$0xff]  ;;  %334 = vmatprep.subr.bf16.mxu0 %v333_v3  ;;  %v92_v14 = vld [vmem:[#allocation5 + $0x190] sm:$0xff]  ;;  %v337_v16 = vpack.c.bf16 %v61_v13, %v60_v11  ;;  %p447_p2 = scmp.ne.s32.totalorder %s254_s6, %s446_s7  ;;  %p452_p4 = scmp.lt.s32.totalorder %s446_s7, %s446_s7 }
  0x2a   :  { %v367_v12 = vpack.c.bf16 %v75_v10, %v74_v9  ;;  %v93_v15 = vld [vmem:[#allocation5 + $0x198] sm:$0xff]  ;;  %366 = vmatprep.subr.bf16.mxu1 %v365_v7  ;;  %v44_v18 = vld [vmem:[#allocation5 + $0x10] sm:$0xff]  ;;  %v62_v23 = vld [vmem:[#allocation5 + $0xa0] sm:$0xff] }
  0x2b   :  { %336 = vmatpush3.bf16.msra.mxu0 %v335_v8  ;;  %v369_v17 = vpack.c.bf16 %v93_v15, %v92_v14  ;;  %v45_v19 = vld [vmem:[#allocation5 + $0x18] sm:$0xff]  ;;  %v76_v20 = vld [vmem:[#allocation5 + $0x110] sm:$0xff]  ;;  %v63_v24 = vld [vmem:[#allocation5 + $0xa8] sm:$0xff]  ;;  %p453_p5 = por %p452_p4, %p451_p3 }
  0x2c   :  { %368 = vmatpush3.bf16.msra.mxu1 %v367_v12  ;;  %v339_v21 = vpack.c.bf16 %v45_v19, %v44_v18  ;;  %v77_v22 = vld [vmem:[#allocation5 + $0x118] sm:$0xff]  ;;  %338 = vmatprep.subr.bf16.mxu0 %v337_v16  ;;  %v341_v26 = vpack.c.bf16 %v63_v24, %v62_v23  ;;  %v94_v27 = vld [vmem:[#allocation5 + $0x1a0] sm:$0xff]  ;;  %v95_v28 = vld [vmem:[#allocation5 + $0x1a8] sm:$0xff] }
  0x2d   :  { %370 = vmatprep.subr.bf16.mxu1 %v369_v17  ;;  %v371_v25 = vpack.c.bf16 %v77_v22, %v76_v20  ;;  %v46_v29 = vld [vmem:[#allocation5 + $0x20] sm:$0xff]  ;;  %v373_v30 = vpack.c.bf16 %v95_v28, %v94_v27  ;;  %v47_v31 = vld [vmem:[#allocation5 + $0x28] sm:$0xff]  ;;  %v64_v35 = vld [vmem:[#allocation5 + $0xb0] sm:$0xff]  ;;  %p454_p6 = pnand %p453_p5, %p447_p2 }
  0x2e   :  { %v78_v32 = vld [vmem:[#allocation5 + $0x120] sm:$0xff]  ;;  %v79_v33 = vld [vmem:[#allocation5 + $0x128] sm:$0xff]  ;;  %v343_v34 = vpack.c.bf16 %v47_v31, %v46_v29  ;;  %v65_v36 = vld [vmem:[#allocation5 + $0xb8] sm:$0xff] }
  0x2f   :  { %340 = vmatpush3.bf16.msra.mxu0 %v339_v21  ;;  %v96_v37 = vld [vmem:[#allocation5 + $0x1b0] sm:$0xff]  ;;  %v375_v38 = vpack.c.bf16 %v79_v33, %v78_v32  ;;  %v345_v39 = vpack.c.bf16 %v65_v36, %v64_v35  ;;  %v97_v40 = vld [vmem:[#allocation5 + $0x1b8] sm:$0xff]  ;;  %v66_v46 = vld [vmem:[#allocation5 + $0xc0] sm:$0xff] }
  0x30   :  { %372 = vmatpush3.bf16.msra.mxu1 %v371_v25  ;;  %342 = vmatprep.subr.bf16.mxu0 %v341_v26  ;;  %v48_v41 = vld [vmem:[#allocation5 + $0x30] sm:$0xff]  ;;  %v49_v42 = vld [vmem:[#allocation5 + $0x38] sm:$0xff]  ;;  %v377_v43 = vpack.c.bf16 %v97_v40, %v96_v37  ;;  %v67_v47 = vld [vmem:[#allocation5 + $0xc8] sm:$0xff] }
  0x31   :  { %374 = vmatprep.subr.bf16.mxu1 %v373_v30  ;;  %v80_v44 = vld [vmem:[#allocation5 + $0x130] sm:$0xff]  ;;  %v81_v45 = vld [vmem:[#allocation5 + $0x138] sm:$0xff]  ;;  %v98_v48 = vld [vmem:[#allocation5 + $0x1c0] sm:$0xff]  ;;  %v347_v50 = vpack.c.bf16 %v49_v42, %v48_v41  ;;  %v349_v52 = vpack.c.bf16 %v67_v47, %v66_v46 }
  0x32   :  { %v99_v49 = vld [vmem:[#allocation5 + $0x1c8] sm:$0xff]  ;;  %v379_v51 = vpack.c.bf16 %v81_v45, %v80_v44  ;;  %v50_v53 = vld [vmem:[#allocation5 + $0x40] sm:$0xff]  ;;  %v68_v58 = vld [vmem:[#allocation5 + $0xd0] sm:$0xff] }
  0x33   :  { %344 = vmatpush3.bf16.msra.mxu0 %v343_v34  ;;  %v51_v54 = vld [vmem:[#allocation5 + $0x48] sm:$0xff]  ;;  %v82_v55 = vld [vmem:[#allocation5 + $0x140] sm:$0xff]  ;;  %v381_v56 = vpack.c.bf16 %v99_v49, %v98_v48  ;;  %v69_v59 = vld [vmem:[#allocation5 + $0xd8] sm:$0xff] }
  0x34   :  { %376 = vmatpush3.bf16.msra.mxu1 %v375_v38  ;;  %346 = vmatprep.subr.bf16.mxu0 %v345_v39  ;;  %v83_v57 = vld [vmem:[#allocation5 + $0x148] sm:$0xff]  ;;  %v100_v60 = vld [vmem:[#allocation5 + $0x1d0] sm:$0xff]  ;;  %v101_v61 = vld [vmem:[#allocation5 + $0x1d8] sm:$0xff]  ;;  %v351_v62 = vpack.c.bf16 %v51_v54, %v50_v53  ;;  %v353_v0 = vpack.c.bf16 %v69_v59, %v68_v58 }
  0x35   :  { %378 = vmatprep.subr.bf16.mxu1 %v377_v43  ;;  %v383_v63 = vpack.c.bf16 %v83_v57, %v82_v55  ;;  %v52_v1 = vld [vmem:[#allocation5 + $0x50] sm:$0xff]  ;;  %v53_v2 = vld [vmem:[#allocation5 + $0x58] sm:$0xff]  ;;  %v385_v4 = vpack.c.bf16 %v101_v61, %v100_v60  ;;  %v70_v6 = vld [vmem:[#allocation5 + $0xe0] sm:$0xff] }
  0x36   :  { %v84_v3 = vld [vmem:[#allocation5 + $0x150] sm:$0xff]  ;;  %v85_v5 = vld [vmem:[#allocation5 + $0x158] sm:$0xff]  ;;  %v71_v7 = vld [vmem:[#allocation5 + $0xe8] sm:$0xff]  ;;  %v355_v10 = vpack.c.bf16 %v53_v2, %v52_v1 }
  0x37   :  { %348 = vmatpush3.bf16.msra.mxu0 %v347_v50  ;;  %v102_v8 = vld [vmem:[#allocation5 + $0x1e0] sm:$0xff]  ;;  %v103_v9 = vld [vmem:[#allocation5 + $0x1e8] sm:$0xff]  ;;  %v387_v13 = vpack.c.bf16 %v85_v5, %v84_v3  ;;  %v357_v14 = vpack.c.bf16 %v71_v7, %v70_v6  ;;  %v41_v17 = vld [vmem:[#allocation2 + $0x18] sm:$0xff] }
  0x38   :  { %380 = vmatpush3.bf16.msra.mxu1 %v379_v51  ;;  %350 = vmatprep.subr.bf16.mxu0 %v349_v52  ;;  %v54_v11 = vld [vmem:[#allocation5 + $0x60] sm:$0xff]  ;;  %v55_v12 = vld [vmem:[#allocation5 + $0x68] sm:$0xff]  ;;  %v389_v18 = vpack.c.bf16 %v103_v9, %v102_v8  ;;  %v72_v20 = vld [vmem:[#allocation5 + $0xf0] sm:$0xff] }
  0x39   :  { %382 = vmatprep.subr.bf16.mxu1 %v381_v56  ;;  %v86_v15 = vld [vmem:[#allocation5 + $0x160] sm:$0xff]  ;;  %v39_v16 = vld [vmem:[#allocation2 + $0x8] sm:$0xff]  ;;  %v73_v21 = vld [vmem:[#allocation5 + $0xf8] sm:$0xff]  ;;  %240 = vmatprep.mubr.f32.mxu1 %v41_v17  ;;  %v359_v24 = vpack.c.bf16 %v55_v12, %v54_v11 }
  0x3a   :  { %v87_v19 = vld [vmem:[#allocation5 + $0x168] sm:$0xff]  ;;  %170 = vmatprep.mubr.f32.mxu0 %v39_v16  ;;  %v104_v22 = vld [vmem:[#allocation5 + $0x1f0] sm:$0xff]  ;;  %v105_v23 = vld [vmem:[#allocation5 + $0x1f8] sm:$0xff]  ;;  %v361_v26 = vpack.c.bf16 %v73_v21, %v72_v20 }
  0x3b   :  { %352 = vmatpush3.bf16.msra.mxu0 %v351_v62  ;;  %v391_v25 = vpack.c.bf16 %v87_v19, %v86_v15  ;;  %v56_v27 = vld [vmem:[#allocation5 + $0x70] sm:$0xff]  ;;  %v57_v28 = vld [vmem:[#allocation5 + $0x78] sm:$0xff]  ;;  %v393_v29 = vpack.c.bf16 %v105_v23, %v104_v22  ;;  %v38_v34 = vld [vmem:[#allocation2] sm:$0xff] }
  0x3c   :  { %384 = vmatpush3.bf16.msra.mxu1 %v383_v63  ;;  %354 = vmatprep.subr.bf16.mxu0 %v353_v0  ;;  %v88_v30 = vld [vmem:[#allocation5 + $0x170] sm:$0xff]  ;;  %v89_v31 = vld [vmem:[#allocation5 + $0x178] sm:$0xff]  ;;  %v363_v32 = vpack.c.bf16 %v57_v28, %v56_v27 }
  0x3d   :  { %386 = vmatprep.subr.bf16.mxu1 %v385_v4  ;;  %v395_v33 = vpack.c.bf16 %v89_v31, %v88_v30  ;;  %v40_v35 = vld [vmem:[#allocation2 + $0x10] sm:$0xff] }
  0x3f   :  { %356 = vmatpush3.bf16.msra.mxu0 %v355_v10 }
  0x40   :  { %388 = vmatpush3.bf16.msra.mxu1 %v387_v13  ;;  %358 = vmatprep.subr.bf16.mxu0 %v357_v14 }
  0x41   :  { %390 = vmatprep.subr.bf16.mxu1 %v389_v18 }
  0x43   :  { %360 = vmatpush3.bf16.msra.mxu0 %v359_v24 }
  0x44   :  { %392 = vmatpush3.bf16.msra.mxu1 %v391_v25  ;;  %362 = vmatprep.subr.bf16.mxu0 %v361_v26 }
  0x45   :  { %394 = vmatprep.subr.bf16.mxu1 %v393_v29 }
  0x47   :  { %364 = vmatpush3.bf16.msra.mxu0 %v363_v32 }
  0x48   :  { %396 = vmatpush3.bf16.msra.mxu1 %v395_v33 }
  0x4a   :  { %171 = vmatmul.mubr.f32.vlgmr.msra.gmra.mrb[0].mxu0 %v38_v34 }
  0x4b   :  { %241 = vmatmul.mubr.f32.vlgmr.msra.gmra.mrb[0].mxu1 %v40_v35 }
 0x11d   :  { %v295_v36 = vpop.f32.mrb[0].mxu0 }
 0x11e   :  { %v330_v37 = vpop.f32.mrb[0].mxu1  ;;  %v296_v38 = vpop.f32.mrb[1].mxu0 }
 0x11f   :  { %v297_v39 = vadd.f32 %v296_v38, %v295_v36  ;;  %v331_v40 = vpop.f32.mrb[1].mxu1 }
 0x120   :  { %v332_v41 = vadd.f32 %v331_v40, %v330_v37 }
 0x122   :  { %v243_v42 = vadd.f32 %v332_v41, %v297_v39 }
 0x124   :  { %246 = vst [vmem:[#allocation7] sm:$0xff] %v243_v42 }
 0x125   :  { %457 = shalt.err (!%p454_p6)
}
 0x126   :  { %s458_s10 = scalar_lea.hbm %s539_s2, 128 }
 0x127   :  { %p459_p7 = scmp.ne.s32.totalorder %s539_s2, %s458_s10  ;;  %p462_p8 = scmp.lt.u32.totalorder %s458_s10, %s539_s2 }
 0x129   :  { %p464_p9 = pnand %p462_p8, %p459_p7 }
 0x12b   :  { %467 = shalt.err (!%p464_p9)
}
 0x12c   :  { %256 = dma.vmem_to_hbm [thread:$0]  %s254_s6, 128, %s539_s2, [#allocation4]  }
 0x12d   :  { %472 = dma.done.wait [#allocation4], 128  }
 0x12e   :  { %473 = vsyncadd [#allocation4], 4294967168 }
 0x12f   :  { %260 = vsyncpa [#allocation3], 1 }
 0x130   :  { %261 = vsyncpa [#allocation6], 1 }
 0x131   :  { %262 = vsyncpa [#allocation4], 1 }

</bundles_post_ra>
